<compile_context>
chip_gen: v5e
topology: v5e:2x2
jax: 0.10.0
libtpu: 0.0.40
codegen_flags: <defaults>
</compile_context>

<pallas_src>
import jax
import jax.numpy as jnp
from jax.experimental import pallas as pl
from jax.experimental.pallas import tpu as pltpu

# Fixed hidden sizes from the PyTorch module.
H1, H2, H3 = 256, 128, 64
H3P = 128                 # layer-3 width padded to a full lane register
OUT_PAD = 128             # tiny num_classes padded to one lane width -> unmasked vst
# Packed bias layout, every offset 128-aligned: [b1 | b2 | b3(pad) | b4(pad)]
B1_OFF, B2_OFF, B3_OFF, B4_OFF = 0, 256, 384, 512
BIAS_WIDTH = 640


def _round_up(x, m):
    return ((x + m - 1) // m) * m


def _choose_tile(batch, tile_batch):
    """Batch tile: large (amortize ~0.35us/step), 256-aligned when possible,
    and yielding >= 2 grid steps so both v7x TensorCores get work; falls back
    to a single full-array tile for tiny batches (exact dims, no padding)."""
    tb = min(_round_up(tile_batch, 256), _round_up(pl.cdiv(batch, 2), 16))
    if tb >= batch or tb <= 0:
        return batch
    return tb


def mlp_kernel(x_ref, w1_ref, w2_ref, w3_ref, w4_ref, b_ref, out_ref):
    """One batch tile of the fused 4-layer MLP.

    MXU operands are bf16; accumulation, bias-add and ReLU stay float32.
    x arrives as f32 and is cast to bf16 on the VPU (free: kernel is HBM-bound).
    """
    x = x_ref[...].astype(jnp.bfloat16)                  # (TB, input_dim)

    b1 = b_ref[:, B1_OFF:B1_OFF + H1]                    # (1, 256) f32
    b2 = b_ref[:, B2_OFF:B2_OFF + H2]                    # (1, 128) f32
    b3 = b_ref[:, B3_OFF:B3_OFF + H3P]                   # (1, 128) f32 (cols>=64 are 0)
    b4 = b_ref[:, B4_OFF:B4_OFF + OUT_PAD]               # (1, 128) f32 (cols>=nc are 0)

    # Layer 1: Linear(input_dim, 256) + ReLU
    h = jnp.dot(x, w1_ref[...], preferred_element_type=jnp.float32) + b1
    h = jnp.maximum(h, 0.0)
    # TODO(synk): nn.Dropout(0.5) is identity in eval mode; training-mode
    # dropout would use pltpu.prng_seed / pltpu.prng_random_bits for the mask.

    # Layer 2: Linear(256, 128) + ReLU
    h = jnp.dot(h.astype(jnp.bfloat16), w2_ref[...],
                preferred_element_type=jnp.float32) + b2
    h = jnp.maximum(h, 0.0)

    # Layer 3: Linear(128, 64) + ReLU, lane-padded 64 -> 128 (padded cols stay 0)
    h = jnp.dot(h.astype(jnp.bfloat16), w3_ref[...],
                preferred_element_type=jnp.float32) + b3
    h = jnp.maximum(h, 0.0)

    # Layer 4: Linear(64, num_classes) padded to 128 lanes (zero rows/cols/bias).
    out = jnp.dot(h.astype(jnp.bfloat16), w4_ref[...],
                  preferred_element_type=jnp.float32) + b4
    out_ref[...] = out.astype(out_ref.dtype)             # bf16 lane-dense store


def simple_classifier_forward(x, kparams, *, tile_batch=1024):
    """x: (B, input_dim) float32; kparams: packed kernel params (see pack_params).

    Returns (B, OUT_PAD) bf16 padded logits; columns >= num_classes are exactly 0.
    Consumers should index [:, :num_classes] (or fuse softmax/argmax/loss) at the
    point of use rather than materializing a separate slice pass over HBM.
    """
    batch, input_dim = x.shape
    tb = _choose_tile(batch, tile_batch)
    grid = (pl.cdiv(batch, tb),)

    w1, w2, w3, w4 = kparams["w1"], kparams["w2"], kparams["w3"], kparams["w4"]
    bias = kparams["bias"]

    flops = 2 * batch * (input_dim * H1 + H1 * H2 + H2 * H3P + H3P * OUT_PAD)
    bytes_accessed = (
        x.size * x.dtype.itemsize                                   # f32 input
        + sum(w.size * w.dtype.itemsize for w in (w1, w2, w3, w4))  # bf16 weights
        + bias.size * bias.dtype.itemsize                           # f32 biases
        + batch * OUT_PAD * 2                                       # bf16 output
    )

    def whole(a):  # weights/biases: one resident VMEM block, same for every tile
        return pl.BlockSpec(a.shape, lambda i: (0, 0))

    out_padded = pl.pallas_call(
        mlp_kernel,
        out_shape=jax.ShapeDtypeStruct((batch, OUT_PAD), jnp.bfloat16),
        grid=grid,
        in_specs=[
            pl.BlockSpec((tb, input_dim), lambda i: (i, 0)),   # x tiled over batch
            whole(w1), whole(w2), whole(w3), whole(w4), whole(bias),
        ],
        out_specs=pl.BlockSpec((tb, OUT_PAD), lambda i: (i, 0)),
        compiler_params=pltpu.CompilerParams(
            dimension_semantics=("parallel",),      # shards batch tiles across v7x TCs
            vmem_limit_bytes=32 * 1024 * 1024,
        ),
        cost_estimate=pl.CostEstimate(
            flops=flops, transcendentals=0, bytes_accessed=bytes_accessed),
    )(x, w1, w2, w3, w4, bias)
    # NOTE: when batch % tb != 0 the edge tile reads Pallas-padded (undefined)
    # rows of x; those only reach output rows that are masked off on store.
    return out_padded


def init_params(key, input_dim, num_classes):
    """Deterministic torch.nn.Linear-like init (uniform +-1/sqrt(fan_in)), f32."""
    dims = [(input_dim, H1), (H1, H2), (H2, H3), (H3, num_classes)]
    params = {}
    for i, (fan_in, fan_out) in enumerate(dims, start=1):
        key, kw, kb = jax.random.split(key, 3)
        bound = 1.0 / jnp.sqrt(float(fan_in))
        params[f"w{i}"] = jax.random.uniform(
            kw, (fan_in, fan_out), jnp.float32, -bound, bound)
        params[f"b{i}"] = jax.random.uniform(
            kb, (1, fan_out), jnp.float32, -bound, bound)
    return params


def pack_params(params, num_classes):
    """Kernel-side params: bf16 MXU weights, H3/out lane-padded, biases packed f32."""
    w3p = jnp.zeros((H2, H3P), jnp.float32).at[:, :H3].set(params["w3"])
    w4p = jnp.zeros((H3P, OUT_PAD), jnp.float32).at[:H3, :num_classes].set(params["w4"])
    bias = jnp.zeros((1, BIAS_WIDTH), jnp.float32)
    bias = bias.at[:, B1_OFF:B1_OFF + H1].set(params["b1"])
    bias = bias.at[:, B2_OFF:B2_OFF + H2].set(params["b2"])
    bias = bias.at[:, B3_OFF:B3_OFF + H3].set(params["b3"])
    bias = bias.at[:, B4_OFF:B4_OFF + num_classes].set(params["b4"])
    return {
        "w1": params["w1"].astype(jnp.bfloat16),
        "w2": params["w2"].astype(jnp.bfloat16),
        "w3": w3p.astype(jnp.bfloat16),
        "w4": w4p.astype(jnp.bfloat16),
        "bias": bias,
    }


def reference_forward_f32(x, params):
    h = jnp.maximum(x @ params["w1"] + params["b1"], 0.0)
    h = jnp.maximum(h @ params["w2"] + params["b2"], 0.0)
    h = jnp.maximum(h @ params["w3"] + params["b3"], 0.0)
    return h @ params["w4"] + params["b4"]


def reference_forward_bf16(x, params):
    """Same bf16-operand / f32-accumulate arithmetic as the kernel (padding is a no-op)."""
    def lin(h, w, b):
        return jnp.dot(h.astype(jnp.bfloat16), w.astype(jnp.bfloat16),
                       preferred_element_type=jnp.float32) + b
    h = jnp.maximum(lin(x, params["w1"], params["b1"]), 0.0)
    h = jnp.maximum(lin(h, params["w2"], params["b2"]), 0.0)
    h = jnp.maximum(lin(h, params["w3"], params["b3"]), 0.0)
    return lin(h, params["w4"], params["b4"])


if __name__ == "__main__":
    batch = 8
    input_dim = 64       # expected_length in the original script (synthetic here)
    num_classes = 10     # len(class_names) in the original script (synthetic here)

    key = jax.random.PRNGKey(0)
    key, kx = jax.random.split(key)
    x = jax.random.normal(kx, (batch, input_dim), jnp.float32)

    params = init_params(key, input_dim, num_classes)
    kparams = pack_params(params, num_classes)

    logits_padded = simple_classifier_forward(x, kparams)
    logits_padded = jax.block_until_ready(logits_padded)

    assert logits_padded.shape == (batch, OUT_PAD)
    assert logits_padded.dtype == jnp.bfloat16
    out = logits_padded[:, :num_classes].astype(jnp.float32)

    # Tight check vs a reference using identical bf16-operand arithmetic
    # (reference rounded through bf16 like the kernel's output store).
    ref_bf16 = reference_forward_bf16(x, params).astype(jnp.bfloat16).astype(jnp.float32)
    assert jnp.allclose(out, ref_bf16, atol=1e-2, rtol=1e-2), "mismatch vs bf16 reference"
    # Loose check vs the pure-f32 (PyTorch-equivalent) reference.
    ref_f32 = reference_forward_f32(x, params)
    assert jnp.allclose(out, ref_f32, atol=6e-2, rtol=6e-2), "mismatch vs f32 reference"
    # Padded logit columns must be exactly zero.
    assert jnp.all(logits_padded[:, num_classes:] == 0)

    print("KERNEL_OK")
</pallas_src>

<mosaic_0001>
module attributes {stable_mosaic.version = 11 : i64} {
  func.func @mlp_kernel(%arg0: i32, %arg1: memref<8x64xf32, #tpu.memory_space<vmem>>, %arg2: memref<64x256xbf16, #tpu.memory_space<vmem>>, %arg3: memref<256x128xbf16, #tpu.memory_space<vmem>>, %arg4: memref<128x128xbf16, #tpu.memory_space<vmem>>, %arg5: memref<128x128xbf16, #tpu.memory_space<vmem>>, %arg6: memref<1x640xf32, #tpu.memory_space<vmem>>, %arg7: memref<8x128xbf16, #tpu.memory_space<vmem>>) attributes {dimension_semantics = [#tpu.dimension_semantics<parallel>], iteration_bounds = array<i64: 1>, scalar_prefetch = 0 : i64, scratch_operands = 0 : i64, tpu.core_type = #tpu.core_type<tc>, window_params = [{transform_indices = @transform_0, window_bounds = array<i64: 8, 64>}, {pipeline_mode = #tpu.pipeline_mode<synchronous>, transform_indices = @transform_1, window_bounds = array<i64: 64, 256>}, {pipeline_mode = #tpu.pipeline_mode<synchronous>, transform_indices = @transform_2, window_bounds = array<i64: 256, 128>}, {pipeline_mode = #tpu.pipeline_mode<synchronous>, transform_indices = @transform_3, window_bounds = array<i64: 128, 128>}, {pipeline_mode = #tpu.pipeline_mode<synchronous>, transform_indices = @transform_4, window_bounds = array<i64: 128, 128>}, {pipeline_mode = #tpu.pipeline_mode<synchronous>, transform_indices = @transform_5, window_bounds = array<i64: 1, 640>}, {transform_indices = @transform_6, window_bounds = array<i64: 8, 128>}]} {
    %c0 = arith.constant 0 : index
    %c0_0 = arith.constant 0 : index
    %0 = vector.load %arg1[%c0, %c0_0] : memref<8x64xf32, #tpu.memory_space<vmem>>, vector<8x64xf32>
    %1 = arith.truncf %0 : vector<8x64xf32> to vector<8x64xbf16>
    %c0_1 = arith.constant 0 : index
    %c0_2 = arith.constant 0 : index
    %2 = vector.load %arg6[%c0_1, %c0_2] : memref<1x640xf32, #tpu.memory_space<vmem>>, vector<1x256xf32>
    %c0_3 = arith.constant 0 : index
    %c256 = arith.constant 256 : index
    %3 = vector.load %arg6[%c0_3, %c256] : memref<1x640xf32, #tpu.memory_space<vmem>>, vector<1x128xf32>
    %c0_4 = arith.constant 0 : index
    %c384 = arith.constant 384 : index
    %4 = vector.load %arg6[%c0_4, %c384] : memref<1x640xf32, #tpu.memory_space<vmem>>, vector<1x128xf32>
    %c0_5 = arith.constant 0 : index
    %c512 = arith.constant 512 : index
    %5 = vector.load %arg6[%c0_5, %c512] : memref<1x640xf32, #tpu.memory_space<vmem>>, vector<1x128xf32>
    %c0_6 = arith.constant 0 : index
    %c0_7 = arith.constant 0 : index
    %6 = vector.load %arg2[%c0_6, %c0_7] : memref<64x256xbf16, #tpu.memory_space<vmem>>, vector<64x256xbf16>
    %cst = arith.constant dense<0.000000e+00> : vector<8x256xf32>
    %7 = tpu.matmul %1, %6, %cst {dimension_numbers = #tpu.dot_dimension_numbers<[1], [0], [0], [1], [0, 0, 1, 1], [], []>} : vector<8x64xbf16>, vector<64x256xbf16>, vector<8x256xf32> -> vector<8x256xf32>
    %8 = vector.broadcast %2 : vector<1x256xf32> to vector<8x256xf32>
    %9 = arith.addf %7, %8 : vector<8x256xf32>
    %cst_8 = arith.constant 0.000000e+00 : f32
    %10 = vector.broadcast %cst_8 : f32 to vector<8x256xf32>
    %11 = arith.maximumf %9, %10 : vector<8x256xf32>
    %12 = arith.truncf %11 : vector<8x256xf32> to vector<8x256xbf16>
    %c0_9 = arith.constant 0 : index
    %c0_10 = arith.constant 0 : index
    %13 = vector.load %arg3[%c0_9, %c0_10] : memref<256x128xbf16, #tpu.memory_space<vmem>>, vector<256x128xbf16>
    %cst_11 = arith.constant dense<0.000000e+00> : vector<8x128xf32>
    %14 = tpu.matmul %12, %13, %cst_11 {dimension_numbers = #tpu.dot_dimension_numbers<[1], [0], [0], [1], [0, 0, 1, 1], [], []>} : vector<8x256xbf16>, vector<256x128xbf16>, vector<8x128xf32> -> vector<8x128xf32>
    %15 = vector.broadcast %3 : vector<1x128xf32> to vector<8x128xf32>
    %16 = arith.addf %14, %15 : vector<8x128xf32>
    %cst_12 = arith.constant 0.000000e+00 : f32
    %17 = vector.broadcast %cst_12 : f32 to vector<8x128xf32>
    %18 = arith.maximumf %16, %17 : vector<8x128xf32>
    %19 = arith.truncf %18 : vector<8x128xf32> to vector<8x128xbf16>
    %c0_13 = arith.constant 0 : index
    %c0_14 = arith.constant 0 : index
    %20 = vector.load %arg4[%c0_13, %c0_14] : memref<128x128xbf16, #tpu.memory_space<vmem>>, vector<128x128xbf16>
    %cst_15 = arith.constant dense<0.000000e+00> : vector<8x128xf32>
    %21 = tpu.matmul %19, %20, %cst_15 {dimension_numbers = #tpu.dot_dimension_numbers<[1], [0], [0], [1], [0, 0, 1, 1], [], []>} : vector<8x128xbf16>, vector<128x128xbf16>, vector<8x128xf32> -> vector<8x128xf32>
    %22 = vector.broadcast %4 : vector<1x128xf32> to vector<8x128xf32>
    %23 = arith.addf %21, %22 : vector<8x128xf32>
    %cst_16 = arith.constant 0.000000e+00 : f32
    %24 = vector.broadcast %cst_16 : f32 to vector<8x128xf32>
    %25 = arith.maximumf %23, %24 : vector<8x128xf32>
    %26 = arith.truncf %25 : vector<8x128xf32> to vector<8x128xbf16>
    %c0_17 = arith.constant 0 : index
    %c0_18 = arith.constant 0 : index
    %27 = vector.load %arg5[%c0_17, %c0_18] : memref<128x128xbf16, #tpu.memory_space<vmem>>, vector<128x128xbf16>
    %cst_19 = arith.constant dense<0.000000e+00> : vector<8x128xf32>
    %28 = tpu.matmul %26, %27, %cst_19 {dimension_numbers = #tpu.dot_dimension_numbers<[1], [0], [0], [1], [0, 0, 1, 1], [], []>} : vector<8x128xbf16>, vector<128x128xbf16>, vector<8x128xf32> -> vector<8x128xf32>
    %29 = vector.broadcast %5 : vector<1x128xf32> to vector<8x128xf32>
    %30 = arith.addf %28, %29 : vector<8x128xf32>
    %31 = arith.truncf %30 : vector<8x128xf32> to vector<8x128xbf16>
    %c0_20 = arith.constant 0 : index
    %c0_21 = arith.constant 0 : index
    %32 = vector.load %arg7[%c0_20, %c0_21] : memref<8x128xbf16, #tpu.memory_space<vmem>>, vector<8x128xbf16>
    tpu.vector_store %arg7[%c0_20, %c0_21], %31 {strides = array<i32>} : memref<8x128xbf16, #tpu.memory_space<vmem>>, vector<8x128xbf16>,
    return
  }
  func.func @transform_0(%arg0: i32) -> (i32, i32) {
    %c0_i32 = arith.constant 0 : i32
    %c0_i32_0 = arith.constant 0 : i32
    return %arg0, %c0_i32 : i32, i32
  }
  func.func @transform_1(%arg0: i32) -> (i32, i32) {
    %c0_i32 = arith.constant 0 : i32
    %c0_i32_0 = arith.constant 0 : i32
    %c0_i32_1 = arith.constant 0 : i32
    return %c0_i32, %c0_i32_0 : i32, i32
  }
  func.func @transform_2(%arg0: i32) -> (i32, i32) {
    %c0_i32 = arith.constant 0 : i32
    %c0_i32_0 = arith.constant 0 : i32
    %c0_i32_1 = arith.constant 0 : i32
    return %c0_i32, %c0_i32_0 : i32, i32
  }
  func.func @transform_3(%arg0: i32) -> (i32, i32) {
    %c0_i32 = arith.constant 0 : i32
    %c0_i32_0 = arith.constant 0 : i32
    %c0_i32_1 = arith.constant 0 : i32
    return %c0_i32, %c0_i32_0 : i32, i32
  }
  func.func @transform_4(%arg0: i32) -> (i32, i32) {
    %c0_i32 = arith.constant 0 : i32
    %c0_i32_0 = arith.constant 0 : i32
    %c0_i32_1 = arith.constant 0 : i32
    return %c0_i32, %c0_i32_0 : i32, i32
  }
  func.func @transform_5(%arg0: i32) -> (i32, i32) {
    %c0_i32 = arith.constant 0 : i32
    %c0_i32_0 = arith.constant 0 : i32
    %c0_i32_1 = arith.constant 0 : i32
    return %c0_i32, %c0_i32_0 : i32, i32
  }
  func.func @transform_6(%arg0: i32) -> (i32, i32) {
    %c0_i32 = arith.constant 0 : i32
    %c0_i32_0 = arith.constant 0 : i32
    return %arg0, %c0_i32 : i32, i32
  }
}

</mosaic_0001>

<bundles_post_ra>
// kernel: tpu_custom_call.1
= control target key start
LH: loop header
LB: loop body
LE: loop exit
PB: predicated region body
PF: predicated region fallthrough
CT: control target
= control target key end

     0   :  { %11 = vsyncpa [#allocation3], 0  ;;  %s1012_s0 = inlined_call_operand.hbm [shape: f32[8,64], index: 0, kind: input, shape index: {}]   ;;  %s1013_s1 = inlined_call_operand.hbm [shape: bf16[64,256], index: 1, kind: input, shape index: {}]   ;;  %s1014_s2 = inlined_call_operand.hbm [shape: bf16[256,128], index: 2, kind: input, shape index: {}]   ;;  %s1015_s3 = inlined_call_operand.hbm [shape: bf16[128,128], index: 3, kind: input, shape index: {}]   ;;  %s1016_s4 = inlined_call_operand.hbm [shape: bf16[128,128], index: 4, kind: input, shape index: {}]   ;;  %s1017_s5 = inlined_call_operand.hbm [shape: f32[1,640], index: 5, kind: input, shape index: {}]   ;;  %s1018_s6 = inlined_call_operand.hbm [shape: bf16[8,128], index: 6, kind: output, shape index: {}]  }
   0x1   :  { %12 = vsyncpa [#allocation6], 0 }
   0x2   :  { %13 = vsyncpa [#allocation9], 0 }
   0x3   :  { %14 = vsyncpa [#allocation12], 0  ;;  %s31_s23 = sshll.u32 %s1013_s1, 4  ;;  %s32_s23 = int_to_ptr.hbm [resolvable:$true] %s31_s23 }
   0x4   :  { %15 = vsyncpa [#allocation4], 0  ;;  %s945_s24 = smov [#allocation5]   ;;  %s946_s26 = smov 128  }
   0x5   :  { %s33_s25 = sshll.u32 %s945_s24, 4  ;;  %s947_s27 = smov 8   ;;  %s34_s25 = int_to_ptr.vmem [resolvable:$true] %s33_s25 }
   0x6   :  { %39 = dma.hbm_to_vmem [thread:$0]  %s32_s23, 1024, %s34_s25, [#allocation6], %s946_s26, %s946_s26, %s947_s27  }
   0x7   :  { %s57_s30 = sshll.u32 %s1015_s3, 4  ;;  %s948_s7 = smov [#allocation8]   ;;  %s58_s30 = int_to_ptr.hbm [resolvable:$true] %s57_s30 }
   0x8   :  { %s59_s8 = sshll.u32 %s948_s7, 4  ;;  %s21_s11 = sshll.u32 %s1012_s0, 4  ;;  %s60_s8 = int_to_ptr.vmem [resolvable:$true] %s59_s8  ;;  %s22_s11 = int_to_ptr.hbm [resolvable:$true] %s21_s11 }
   0x9   :  { %s949_s1 = smov 64   ;;  %s950_s12 = smov 4  }
   0xa   :  { %65 = dma.hbm_to_vmem [thread:$0]  %s58_s30, 1024, %s60_s8, [#allocation9], %s949_s1, %s949_s1, %s950_s12  }
   0xb   :  { %s44_s15 = sshll.u32 %s1014_s2, 4  ;;  %s951_s16 = smov [#allocation2]   ;;  %s45_s15 = int_to_ptr.hbm [resolvable:$true] %s44_s15 }
   0xc   :  { %s23_s17 = sshll.u32 %s951_s16, 4  ;;  %s952_s3 = smov [#allocation7]   ;;  %s24_s17 = int_to_ptr.vmem [resolvable:$true] %s23_s17 }
   0xd   :  { %26 = dma.hbm_to_vmem [thread:$0]  %s22_s11, 128, %s24_s17, [#allocation3]  }
   0xe   :  { %s46_s18 = sshll.u32 %s952_s3, 4  ;;  %s70_s0 = sshll.u32 %s1016_s4, 4  ;;  %s47_s18 = int_to_ptr.vmem [resolvable:$true] %s46_s18  ;;  %s71_s0 = int_to_ptr.hbm [resolvable:$true] %s70_s0 }
   0xf   :  { %52 = dma.hbm_to_vmem [thread:$0]  %s45_s15, 2048, %s47_s18, [#allocation6], %s949_s1, %s949_s1, %s950_s12  }
  0x10   :  { %s84_s23 = sshll.u32 %s1017_s5, 4  ;;  %s953_s24 = smov [#allocation10]   ;;  %s85_s23 = int_to_ptr.hbm [resolvable:$true] %s84_s23 }
  0x11   :  { %s72_s2 = sshll.u32 %s953_s24, 4  ;;  %s954_s25 = smov [#allocation11]   ;;  %s73_s2 = int_to_ptr.vmem [resolvable:$true] %s72_s2 }
  0x12   :  { %78 = dma.hbm_to_vmem [thread:$0]  %s71_s0, 1024, %s73_s2, [#allocation9], %s949_s1, %s949_s1, %s950_s12  }
  0x13   :  { %s86_s26 = sshll.u32 %s954_s25, 4  ;;  %s87_s26 = int_to_ptr.vmem [resolvable:$true] %s86_s26 }
  0x14   :  { %89 = dma.hbm_to_vmem [thread:$0]  %s85_s23, 80, %s87_s26, [#allocation12]  }
  0x15   :  { %935 = dma.done.wait [#allocation3], 128  }
  0x16   :  { %936 = vsyncadd [#allocation3], 4294967168 }
  0x17   :  { %937 = dma.done.wait [#allocation6], 3072  }
  0x18   :  { %938 = vsyncadd [#allocation6], 4294964224 }
  0x19   :  { %939 = dma.done.wait [#allocation9], 2048  }
  0x1a   :  { %940 = vsyncadd [#allocation9], 4294965248 }
  0x1b   :  { %941 = dma.done.wait [#allocation12], 80  }
  0x1c   :  { %942 = vsyncadd [#allocation12], 4294967216  ;;  %v577_v0 = vld [vmem:[#allocation5 + $0x30] sm:$0xf]  ;;  %v720_v1 = vld [vmem:[#allocation5 + $0x34] sm:$0xf0] }
  0x1d   :  { %v719_v2 = vld [vmem:[#allocation5 + $0x34] sm:$0xf]  ;;  %v578_v3 = vor.u32 %v720_v1, %v577_v0  ;;  %v579_v4 = vld [vmem:[#allocation5 + $0x38] sm:$0xf0]  ;;  %v569_v5 = vld [vmem:[#allocation5 + $0x20] sm:$0xf] }
  0x1e   :  { %v718_v6 = vld [vmem:[#allocation5 + $0x24] sm:$0xf0]  ;;  %v582_v7 = vor.u32 %v719_v2, %v579_v4  ;;  %v717_v8 = vld [vmem:[#allocation5 + $0x24] sm:$0xf]  ;;  %v571_v9 = vld [vmem:[#allocation5 + $0x28] sm:$0xf0] }
  0x1f   :  { %182 = vmatpush.bf16.msra.mxu0 %v578_v3  ;;  %v570_v10 = vor.u32 %v718_v6, %v569_v5  ;;  %v574_v11 = vor.u32 %v717_v8, %v571_v9  ;;  %v561_v12 = vld [vmem:[#allocation5 + $0x10] sm:$0xf]  ;;  %v716_v13 = vld [vmem:[#allocation5 + $0x14] sm:$0xf0]  ;;  %v715_v14 = vld [vmem:[#allocation5 + $0x14] sm:$0xf] }
  0x20   :  { %195 = vmatpush.bf16.msra.mxu1 %v582_v7  ;;  %v563_v15 = vld [vmem:[#allocation5 + $0x18] sm:$0xf0]  ;;  %v562_v18 = vor.u32 %v716_v13, %v561_v12  ;;  %v727_v19 = vld [vmem:[#allocation7 + $0x30] sm:$0xff]  ;;  %v553_v21 = vld [vmem:[#allocation5] sm:$0xf]  ;;  %vm174_vm0 = vcmask 523264  }
  0x21   :  { %v728_v16 = vld [vmem:[#allocation7 + $0x38] sm:$0xff]  ;;  %v566_v20 = vor.u32 %v715_v14, %v563_v15  ;;  %v714_v22 = vld [vmem:[#allocation5 + $0x4] sm:$0xf0]  ;;  %v735_v23 = vld [vmem:[#allocation7 + $0x70] sm:$0xff]  ;;  %s955_s4 = smov [#allocation13]   ;;  %s538_s29 = sshll.u32 %s1018_s6, 4  ;;  %s539_s29 = int_to_ptr.hbm [resolvable:$true] %s538_s29 }
  0x22   :  { %v736_v17 = vld [vmem:[#allocation7 + $0x78] sm:$0xff]  ;;  %339 = vmatpush.bf16.msra.mxu2 %v728_v16  ;;  %v713_v24 = vld [vmem:[#allocation5 + $0x4] sm:$0xf]  ;;  %v555_v25 = vld [vmem:[#allocation5 + $0x8] sm:$0xf0]  ;;  %v554_v26 = vor.u32 %v714_v22, %v553_v21  ;;  %s536_s5 = sshll.u32 %s955_s4, 4  ;;  %s537_s5 = int_to_ptr.vmem [resolvable:$true] %s536_s5 }
  0x23   :  { %183 = vmatpush.bf16.msra.mxu0 %v570_v10  ;;  %352 = vmatpush.bf16.msra.mxu3 %v736_v17  ;;  %v115_v27 = vld [vmem:[#allocation2] sm:$0xff]  ;;  %v726_v28 = vld [vmem:[#allocation7 + $0x28] sm:$0xff]  ;;  %v558_v29 = vor.u32 %v713_v24, %v555_v25  ;;  %v725_v32 = vld [vmem:[#allocation7 + $0x20] sm:$0xff] }
  0x24   :  { %196 = vmatpush.bf16.msra.mxu1 %v574_v11  ;;  %v734_v30 = vld [vmem:[#allocation7 + $0x68] sm:$0xff]  ;;  %v116_v31 = vpack.c.bf16 %v115_v27, %v115_v27  ;;  %v733_v33 = vld [vmem:[#allocation7 + $0x60] sm:$0xff]  ;;  %v724_v34 = vld [vmem:[#allocation7 + $0x18] sm:$0xff] }
  0x25   :  { %v732_v35 = vld [vmem:[#allocation7 + $0x58] sm:$0xff]  ;;  %v723_v36 = vld [vmem:[#allocation7 + $0x10] sm:$0xff]  ;;  %v722_v38 = vld [vmem:[#allocation7 + $0x8] sm:$0xff] }
  0x26   :  { %340 = vmatpush.bf16.msra.mxu2 %v727_v19  ;;  %v731_v37 = vld [vmem:[#allocation7 + $0x50] sm:$0xff]  ;;  %v730_v39 = vld [vmem:[#allocation7 + $0x48] sm:$0xff]  ;;  %v721_v40 = vld [vmem:[#allocation7] sm:$0xff] }
  0x27   :  { %184 = vmatpush.bf16.msra.mxu0 %v562_v18  ;;  %353 = vmatpush.bf16.msra.mxu3 %v735_v23  ;;  %v729_v41 = vld [vmem:[#allocation7 + $0x40] sm:$0xff]  ;;  %v744_v42 = vld [vmem:[#allocation8 + $0x38] sm:$0xff]  ;;  %v743_v43 = vld [vmem:[#allocation8 + $0x30] sm:$0xff] }
  0x28   :  { %197 = vmatpush.bf16.msra.mxu1 %v566_v20  ;;  %v742_v44 = vld [vmem:[#allocation8 + $0x28] sm:$0xff]  ;;  %v741_v45 = vld [vmem:[#allocation8 + $0x20] sm:$0xff]  ;;  %v740_v46 = vld [vmem:[#allocation8 + $0x18] sm:$0xff] }
  0x29   :  { %v117_v47 = vld [vmem:[#allocation11] sm:$0x3]  ;;  %v739_v48 = vld [vmem:[#allocation8 + $0x10] sm:$0xff]  ;;  %v738_v61 = vld [vmem:[#allocation8 + $0x8] sm:$0xff] }
  0x2a   :  { %341 = vmatpush.bf16.msra.mxu2 %v726_v28  ;;  %v130_v49 = vperm.slane %v117_v47, 0  ;;  %v131_v50 = vperm.slane %v117_v47, 1  ;;  %v737_v62 = vld [vmem:[#allocation8] sm:$0xff]  ;;  %v752_v63 = vld [vmem:[#allocation10 + $0x38] sm:$0xff]  ;;  %v751_v0 = vld [vmem:[#allocation10 + $0x30] sm:$0xff] }
  0x2b   :  { %185 = vmatpush.bf16.msra.mxu0 %v554_v26  ;;  %354 = vmatpush.bf16.msra.mxu3 %v734_v30  ;;  %v750_v1 = vld [vmem:[#allocation10 + $0x28] sm:$0xff]  ;;  %v749_v2 = vld [vmem:[#allocation10 + $0x20] sm:$0xff]  ;;  %v748_v3 = vld [vmem:[#allocation10 + $0x18] sm:$0xff] }
  0x2c   :  { %198 = vmatpush.bf16.msra.mxu1 %v558_v29  ;;  %v747_v4 = vld [vmem:[#allocation10 + $0x10] sm:$0xff]  ;;  %v764_v5 = vld [vmem:[#allocation11 + $0x2] ss:$0 sm:$0xff]  ;;  %v746_v14 = vld [vmem:[#allocation10 + $0x8] sm:$0xff] }
  0x2d   :  { %v745_v15 = vld [vmem:[#allocation10] sm:$0xff] }
  0x2e   :  { %583 = vmatmul.msk.bf16.vlgmr.msra.gmra.mxu0 %vm174_vm0, %v116_v31  ;;  %342 = vmatpush.bf16.msra.mxu2 %v725_v32  ;;  %v765_v16 = vld [vmem:[#allocation11 + $0x3] ss:$0 sm:$0xff]  ;;  %v766_v22 = vld [vmem:[#allocation11 + $0x4] ss:$0 sm:$0xff] }
  0x2f   :  { %584 = vmatmul.msk.bf16.vlgmr.msra.gmra.mxu1 %vm174_vm0, %v116_v31  ;;  %355 = vmatpush.bf16.msra.mxu3 %v733_v33 }
  0x30   :  { %434 = vmatpush.bf16.msrb.mxu0 %v744_v42  ;;  %516 = vmatpush.bf16.msrb.mxu1 %v752_v63 }
  0x32   :  { %343 = vmatpush.bf16.msra.mxu2 %v724_v34 }
  0x33   :  { %356 = vmatpush.bf16.msra.mxu3 %v732_v35 }
  0x34   :  { %435 = vmatpush.bf16.msrb.mxu0 %v743_v43  ;;  %517 = vmatpush.bf16.msrb.mxu1 %v751_v0 }
  0x36   :  { %344 = vmatpush.bf16.msra.mxu2 %v723_v36 }
  0x37   :  { %357 = vmatpush.bf16.msra.mxu3 %v731_v37 }
  0x38   :  { %436 = vmatpush.bf16.msrb.mxu0 %v742_v44  ;;  %518 = vmatpush.bf16.msrb.mxu1 %v750_v1 }
  0x3a   :  { %345 = vmatpush.bf16.msra.mxu2 %v722_v38 }
  0x3b   :  { %358 = vmatpush.bf16.msra.mxu3 %v730_v39 }
  0x3c   :  { %437 = vmatpush.bf16.msrb.mxu0 %v741_v45  ;;  %519 = vmatpush.bf16.msrb.mxu1 %v749_v2 }
  0x3e   :  { %346 = vmatpush.bf16.msra.mxu2 %v721_v40 }
  0x3f   :  { %359 = vmatpush.bf16.msra.mxu3 %v729_v41 }
  0x40   :  { %438 = vmatpush.bf16.msrb.mxu0 %v740_v46  ;;  %520 = vmatpush.bf16.msrb.mxu1 %v748_v3 }
  0x44   :  { %439 = vmatpush.bf16.msrb.mxu0 %v739_v48  ;;  %521 = vmatpush.bf16.msrb.mxu1 %v747_v4 }
  0x48   :  { %440 = vmatpush.bf16.msrb.mxu0 %v738_v61  ;;  %522 = vmatpush.bf16.msrb.mxu1 %v746_v14 }
  0x4c   :  { %441 = vmatpush.bf16.msrb.mxu0 %v737_v62  ;;  %523 = vmatpush.bf16.msrb.mxu1 %v745_v15 }
  0xab   :  { %v187_v51 = vpop.f32.mrf.mxu0 }
  0xac   :  { %v188_v52 = vadd.f32 %v187_v51, %v130_v49  ;;  %v200_v53 = vpop.f32.mrf.mxu1 }
  0xad   :  { %v201_v54 = vadd.f32 %v200_v53, %v131_v50 }
  0xae   :  { %v204_v55 = vmax.f32 %v188_v52, 0.0 }
  0xaf   :  { %v205_v56 = vmax.f32 %v201_v54, 0.0 }
  0xb0   :  { %v206_v57 = vpack.c.bf16 %v204_v55, %v204_v55 }
  0xb1   :  { %v207_v58 = vpack.c.bf16 %v205_v56, %v205_v56 }
  0xb2   :  { %347 = vmatmul.bf16.vlgmr.msra.gmra.mxu2 %v206_v57 }
  0xb3   :  { %360 = vmatmul.bf16.vlgmr.msra.gmra.mxu3 %v207_v58  ;;  %v189_v59 = vpop.f32.mrf.mxu0 }
  0xb4   :  { %v202_v60 = vpop.f32.mrf.mxu1 }
 0x135   :  { %v348_v6 = vpop.f32.mrf.mxu2 }
 0x136   :  { %v349_v7 = vadd.f32 %v764_v5, %v348_v6  ;;  %v361_v8 = vpop.f32.mrf.mxu3 }
 0x138   :  { %v362_v9 = vadd.f32 %v361_v8, %v349_v7 }
 0x13a   :  { %v365_v10 = vmax.f32 %v362_v9, 0.0 }
 0x13c   :  { %v366_v11 = vpack.c.bf16 %v365_v10, %v365_v10 }
 0x13d   :  { %v350_v12 = vpop.f32.mrf.mxu2 }
 0x13e   :  { %v363_v13 = vpop.f32.mrf.mxu3  ;;  %442 = vmatmul.bf16.vlgmr.msrb.gmra.mxu0 %v366_v11 }
 0x1bb   :  { %v443_v17 = vpop.f32.mrf.mxu0 }
 0x1bc   :  { %v444_v18 = vadd.f32 %v765_v16, %v443_v17 }
 0x1be   :  { %v447_v19 = vmax.f32 %v444_v18, 0.0 }
 0x1c0   :  { %v448_v20 = vpack.c.bf16 %v447_v19, %v447_v19 }
 0x1c2   :  { %524 = vmatmul.bf16.vlgmr.msrb.gmra.mxu1 %v448_v20 }
 0x1c3   :  { %v445_v21 = vpop.f32.mrf.mxu0 }
 0x23f   :  { %v525_v23 = vpop.f32.mrf.mxu1 }
 0x240   :  { %v526_v24 = vadd.f32 %v766_v22, %v525_v23 }
 0x242   :  { %v529_v25 = vpack.c.bf16 %v526_v24, %v526_v24 }
 0x244   :  { %530 = vst [vmem:[#allocation13] sm:$0xf] %v529_v25 }
 0x245   :  { %541 = dma.vmem_to_hbm [thread:$0]  %s537_s5, 64, %s539_s29, [#allocation4]  }
 0x247   :  { %v527_v26 = vpop.f32.mrf.mxu1 }
 0x248   :  { %943 = dma.done.wait [#allocation4], 64  }
 0x249   :  { %944 = vsyncadd [#allocation4], 4294967232 }
 0x24a   :  { %546 = vsyncpa [#allocation3], 1 }
 0x24b   :  { %547 = vsyncpa [#allocation6], 1 }
 0x24c   :  { %548 = vsyncpa [#allocation9], 1 }
 0x24d   :  { %549 = vsyncpa [#allocation12], 1 }
 0x24e   :  { %550 = vsyncpa [#allocation4], 1 }

</bundles_post_ra>
